<compile_context>
chip_gen: v7x
topology: tpu7x:2x2x1
jax: 0.10.0
libtpu: 0.0.40
codegen_flags: <defaults>
</compile_context>

<pallas_src>
import functools

import jax
import jax.numpy as jnp
from jax.experimental import pallas as pl
from jax.experimental.pallas import tpu as pltpu


# TODO(synk): dropout (p > 0 / training mode) and the 'gelu'/'glu' activation
# variants are not implemented; defaults (dropout=0.0, relu) are covered.
# TODO(synk): forward_pre (normalize_before=True) is not implemented; the module
# default (normalize_before=False => forward_post) is what this kernel computes.


def ffn_layer_kernel(x_ref, w1_ref, b1_ref, w2_ref, b2_ref, g_ref, beta_ref,
                     o_ref, *, mxu_bf16):
    """Fused linear1 -> relu -> linear2 -> residual add -> LayerNorm for one
    (TM, D) row tile."""
    x = x_ref[...]                                    # (TM, D) native dtype

    w1 = w1_ref[...]
    w2 = w2_ref[...]
    x_mxu = x
    if mxu_bf16:
        # v5e fast path: MXU peak needs bf16 operands; accumulation stays f32.
        x_mxu = x_mxu.astype(jnp.bfloat16)
        w1 = w1.astype(jnp.bfloat16)
        w2 = w2.astype(jnp.bfloat16)

    # linear1 on the MXU, f32 accumulation
    h = jnp.dot(x_mxu, w1, preferred_element_type=jnp.float32)    # (TM, Fp) f32

    # bias1 + ReLU + downcast fused into a single pass over the (TM, Fp) hidden.
    hdt = w2.dtype
    if hdt == jnp.bfloat16:
        # bf16 VALU (v6e/v7x) processes 2x elements per vreg and halves the
        # hidden's VMEM load/store traffic before the second matmul.
        h = jnp.maximum(h.astype(jnp.bfloat16) + b1_ref[...].astype(jnp.bfloat16), 0.0)
    else:
        h = jnp.maximum(h + b1_ref[...].astype(jnp.float32), 0.0).astype(hdt)

    # linear2 (+ bias), f32 accumulation
    y = jnp.dot(h, w2, preferred_element_type=jnp.float32)        # (TM, D) f32
    y = y + b2_ref[...].astype(jnp.float32)

    # residual + LayerNorm epilogue in f32, single-pass statistics.
    z = x.astype(jnp.float32) + y
    mean = jnp.mean(z, axis=-1, keepdims=True)
    var = jnp.maximum(jnp.mean(z * z, axis=-1, keepdims=True) - mean * mean, 0.0)
    inv = jax.lax.rsqrt(var + 1e-5)
    out = (z - mean) * inv * g_ref[...].astype(jnp.float32) \
          + beta_ref[...].astype(jnp.float32)
    o_ref[...] = out.astype(o_ref.dtype)


def _round_up(x, m):
    return ((x + m - 1) // m) * m


def _choose_tm(n_rows, tm_cap):
    """Row-tile size: sublane(8)/MXU-granule(128) aligned, capped by tm_cap, and
    an even number of grid steps when N is large enough (balanced megacore
    sharding on v7x; near-neutral elsewhere, per-step overhead ~0.35 us)."""
    tm_cap = max(128, (tm_cap // 128) * 128)
    if n_rows < 256:
        return min(_round_up(n_rows, 8), tm_cap)
    steps = max(2, pl.cdiv(n_rows, tm_cap))
    if steps % 2:
        steps += 1
    return min(_round_up(pl.cdiv(n_rows, steps), 128), tm_cap)


def prepare_ffn_params(w1, b1, w2, b2, gamma, beta):
    """One-time parameter preparation (do NOT call per forward pass):
    zero-pads dim_feedforward to a multiple of 128 (lane-dense hidden, math
    preserving) and reshapes biases / LayerNorm params to (1, dim) rows.
    Weights are (in, out) so the kernel computes x @ W.  For the v5e fast path,
    pass bf16 weights here (or use mxu_bf16=True in ffn_layer)."""
    D, F = w1.shape
    f_pad = (-F) % 128
    if f_pad:
        w1 = jnp.pad(w1, ((0, 0), (0, f_pad)))
        b1 = jnp.pad(b1, ((0, f_pad),))
        w2 = jnp.pad(w2, ((0, f_pad), (0, 0)))
    Fp = F + f_pad
    # TODO(synk): d_model is not padded (would change LayerNorm statistics);
    # real Mask2Former d_model=256 is already 128-aligned.
    return (w1, b1.reshape(1, Fp), w2, b2.reshape(1, D),
            gamma.reshape(1, D), beta.reshape(1, D))


@functools.partial(
    jax.jit,
    static_argnames=("tm", "mxu_bf16", "vmem_limit_bytes", "single_buffer_weights"))
def _ffn_layer_2d(x2d, w1, b1r, w2, b2r, gr, br, *, tm, mxu_bf16,
                  vmem_limit_bytes, single_buffer_weights):
    N, D = x2d.shape
    Fp = w1.shape[1]
    grid = (pl.cdiv(N, tm),)          # ragged last block is masked by Pallas

    row_spec = pl.BlockSpec((tm, D), lambda i: (i, 0))
    if single_buffer_weights:
        # Constant index_map => never re-fetched; a single VMEM buffer suffices
        # (frees ~|w1|+|w2| of VMEM headroom, most valuable on v7x's 64 MiB).
        def resident(shape):
            return pl.BlockSpec(shape, lambda i: tuple(0 for _ in shape),
                                pipeline_mode=pl.Buffered(1))
    else:
        def resident(shape):
            return pl.BlockSpec(shape, lambda i: tuple(0 for _ in shape))

    params = dict(dimension_semantics=("parallel",))
    if vmem_limit_bytes is not None:
        params["vmem_limit_bytes"] = vmem_limit_bytes

    return pl.pallas_call(
        functools.partial(ffn_layer_kernel, mxu_bf16=mxu_bf16),
        out_shape=jax.ShapeDtypeStruct((N, D), x2d.dtype),
        grid=grid,
        in_specs=[
            row_spec,            # x tile (pipelined over the row grid)
            resident((D, Fp)),   # w1   (VMEM-resident)
            resident((1, Fp)),   # b1
            resident((Fp, D)),   # w2
            resident((1, D)),    # b2
            resident((1, D)),    # gamma
            resident((1, D)),    # beta
        ],
        out_specs=row_spec,
        compiler_params=pltpu.CompilerParams(**params),
    )(x2d, w1, b1r, w2, b2r, gr, br)


def ffn_layer(tgt, params, *, tm_cap=1024, mxu_bf16=False, vmem_limit_bytes=None):
    """FFNLayer.forward_post.  tgt: (S, B, D); params: prepare_ffn_params(...).

    tm_cap: row-tile cap.  1024 keeps the f32 hidden footprint (tm*Fp*4 plus a
    bf16 copy) under the 32 MiB default scoped VMEM for F=2048 on v6e/v7x; going
    higher buys almost nothing since weights are VMEM-resident and per-step
    overhead is ~0.35 us (raise vmem_limit_bytes if you sweep up on v5e/v6e).
    mxu_bf16: force bf16 MXU operands for f32 callers (v5e fast path).
    """
    w1, b1r, w2, b2r, gr, br = params
    S, B, D = tgt.shape
    N = S * B
    x2d = tgt.reshape(N, D)                  # metadata-only flatten, D = lane axis
    tm = _choose_tm(N, tm_cap)
    kwargs = dict(tm=tm, mxu_bf16=mxu_bf16, vmem_limit_bytes=vmem_limit_bytes)
    try:
        out = _ffn_layer_2d(x2d, w1, b1r, w2, b2r, gr, br,
                            single_buffer_weights=True, **kwargs)
    except Exception:
        # Fallback for Pallas builds that reject per-spec pipeline_mode/Buffered(1).
        out = _ffn_layer_2d(x2d, w1, b1r, w2, b2r, gr, br,
                            single_buffer_weights=False, **kwargs)
    return out.reshape(S, B, D)


def xavier_uniform(key, shape, dtype=jnp.float32):
    fan_in, fan_out = shape[0], shape[1]
    limit = (6.0 / (fan_in + fan_out)) ** 0.5
    return jax.random.uniform(key, shape, dtype, minval=-limit, maxval=limit)


if __name__ == "__main__":
    d_model = 32
    dim_feedforward = 64
    seq, batch = 8, 2

    key = jax.random.PRNGKey(0)
    k_x, k_w1, k_w2 = jax.random.split(key, 3)

    # parameters (xavier_uniform_ on weights like _reset_parameters; biases zero,
    # LayerNorm gamma=1, beta=0); weights stored as (in, out) = torch weight^T
    w1 = xavier_uniform(k_w1, (d_model, dim_feedforward))
    b1 = jnp.zeros((dim_feedforward,), jnp.float32)
    w2 = xavier_uniform(k_w2, (dim_feedforward, d_model))
    b2 = jnp.zeros((d_model,), jnp.float32)
    gamma = jnp.ones((d_model,), jnp.float32)
    beta = jnp.zeros((d_model,), jnp.float32)

    tgt = jax.random.normal(k_x, (seq, batch, d_model), jnp.float32)

    # one-time parameter preparation (padding / reshapes out of the per-call path)
    params_f32 = prepare_ffn_params(w1, b1, w2, b2, gamma, beta)

    # --- f32 run, tight check against a plain-JAX reference ---
    out = jax.block_until_ready(ffn_layer(tgt, params_f32))

    x2d = tgt.reshape(-1, d_model)
    h = jnp.maximum(x2d @ w1 + b1, 0.0)
    z = x2d + (h @ w2 + b2)
    mu = z.mean(-1, keepdims=True)
    var = ((z - mu) ** 2).mean(-1, keepdims=True)
    ref = ((z - mu) / jnp.sqrt(var + 1e-5)) * gamma + beta
    ref = ref.reshape(seq, batch, d_model)
    assert jnp.allclose(out, ref, atol=2e-5, rtol=2e-5), \
        float(jnp.max(jnp.abs(out - ref)))

    # --- bf16 run (native bf16 MXU operands, f32 epilogue) — loose sanity check ---
    params_bf16 = prepare_ffn_params(w1.astype(jnp.bfloat16), b1,
                                     w2.astype(jnp.bfloat16), b2, gamma, beta)
    out_bf = jax.block_until_ready(ffn_layer(tgt.astype(jnp.bfloat16), params_bf16))
    assert float(jnp.max(jnp.abs(out_bf.astype(jnp.float32) - ref))) < 0.15

    # --- f32 inputs with forced-bf16 MXU operands (v5e fast path) ---
    out_mx = jax.block_until_ready(ffn_layer(tgt, params_f32, mxu_bf16=True))
    assert float(jnp.max(jnp.abs(out_mx - ref))) < 0.15

    print("KERNEL_OK")
</pallas_src>

<mosaic_0001>
module attributes {stable_mosaic.version = 11 : i64} {
  func.func @ffn_layer_kernel(%arg0: i32, %arg1: memref<16x32xf32, #tpu.memory_space<vmem>>, %arg2: memref<32x128xf32, #tpu.memory_space<vmem>>, %arg3: memref<1x128xf32, #tpu.memory_space<vmem>>, %arg4: memref<128x32xf32, #tpu.memory_space<vmem>>, %arg5: memref<1x32xf32, #tpu.memory_space<vmem>>, %arg6: memref<1x32xf32, #tpu.memory_space<vmem>>, %arg7: memref<1x32xf32, #tpu.memory_space<vmem>>, %arg8: memref<16x32xf32, #tpu.memory_space<vmem>>) attributes {dimension_semantics = [#tpu.dimension_semantics<parallel>], iteration_bounds = array<i64: 1>, scalar_prefetch = 0 : i64, scratch_operands = 0 : i64, tpu.core_type = #tpu.core_type<tc>, window_params = [{transform_indices = @transform_0, window_bounds = array<i64: 16, 32>}, {pipeline_mode = #tpu.pipeline_mode<synchronous>, transform_indices = @transform_1, window_bounds = array<i64: 32, 128>}, {pipeline_mode = #tpu.pipeline_mode<synchronous>, transform_indices = @transform_2, window_bounds = array<i64: 1, 128>}, {pipeline_mode = #tpu.pipeline_mode<synchronous>, transform_indices = @transform_3, window_bounds = array<i64: 128, 32>}, {pipeline_mode = #tpu.pipeline_mode<synchronous>, transform_indices = @transform_4, window_bounds = array<i64: 1, 32>}, {pipeline_mode = #tpu.pipeline_mode<synchronous>, transform_indices = @transform_5, window_bounds = array<i64: 1, 32>}, {pipeline_mode = #tpu.pipeline_mode<synchronous>, transform_indices = @transform_6, window_bounds = array<i64: 1, 32>}, {transform_indices = @transform_7, window_bounds = array<i64: 16, 32>}]} {
    %c0 = arith.constant 0 : index
    %c0_0 = arith.constant 0 : index
    %0 = vector.load %arg1[%c0, %c0_0] : memref<16x32xf32, #tpu.memory_space<vmem>>, vector<16x32xf32>
    %c0_1 = arith.constant 0 : index
    %c0_2 = arith.constant 0 : index
    %1 = vector.load %arg2[%c0_1, %c0_2] : memref<32x128xf32, #tpu.memory_space<vmem>>, vector<32x128xf32>
    %c0_3 = arith.constant 0 : index
    %c0_4 = arith.constant 0 : index
    %2 = vector.load %arg4[%c0_3, %c0_4] : memref<128x32xf32, #tpu.memory_space<vmem>>, vector<128x32xf32>
    %cst = arith.constant dense<0.000000e+00> : vector<16x128xf32>
    %3 = tpu.matmul %0, %1, %cst {dimension_numbers = #tpu.dot_dimension_numbers<[1], [0], [0], [1], [0, 0, 1, 1], [], []>} : vector<16x32xf32>, vector<32x128xf32>, vector<16x128xf32> -> vector<16x128xf32>
    %c0_5 = arith.constant 0 : index
    %c0_6 = arith.constant 0 : index
    %4 = vector.load %arg3[%c0_5, %c0_6] : memref<1x128xf32, #tpu.memory_space<vmem>>, vector<1x128xf32>
    %5 = vector.broadcast %4 : vector<1x128xf32> to vector<16x128xf32>
    %6 = arith.addf %3, %5 : vector<16x128xf32>
    %cst_7 = arith.constant 0.000000e+00 : f32
    %7 = vector.broadcast %cst_7 : f32 to vector<16x128xf32>
    %8 = arith.maximumf %6, %7 : vector<16x128xf32>
    %cst_8 = arith.constant dense<0.000000e+00> : vector<16x32xf32>
    %9 = tpu.matmul %8, %2, %cst_8 {dimension_numbers = #tpu.dot_dimension_numbers<[1], [0], [0], [1], [0, 0, 1, 1], [], []>} : vector<16x128xf32>, vector<128x32xf32>, vector<16x32xf32> -> vector<16x32xf32>
    %c0_9 = arith.constant 0 : index
    %c0_10 = arith.constant 0 : index
    %10 = vector.load %arg5[%c0_9, %c0_10] : memref<1x32xf32, #tpu.memory_space<vmem>>, vector<1x32xf32>
    %11 = vector.broadcast %10 : vector<1x32xf32> to vector<16x32xf32>
    %12 = arith.addf %9, %11 : vector<16x32xf32>
    %13 = arith.addf %0, %12 : vector<16x32xf32>
    %cst_11 = arith.constant dense<0.000000e+00> : vector<16xf32>
    %14 = vector.multi_reduction <add>, %13, %cst_11 [1] : vector<16x32xf32> to vector<16xf32>
    %15 = vector.shape_cast %14 : vector<16xf32> to vector<16x1xf32>
    %cst_12 = arith.constant 3.200000e+01 : f32
    %16 = vector.broadcast %cst_12 : f32 to vector<16x1xf32>
    %17 = arith.divf %15, %16 : vector<16x1xf32>
    %18 = arith.mulf %13, %13 : vector<16x32xf32>
    %cst_13 = arith.constant dense<0.000000e+00> : vector<16xf32>
    %19 = vector.multi_reduction <add>, %18, %cst_13 [1] : vector<16x32xf32> to vector<16xf32>
    %20 = vector.shape_cast %19 : vector<16xf32> to vector<16x1xf32>
    %cst_14 = arith.constant 3.200000e+01 : f32
    %21 = vector.broadcast %cst_14 : f32 to vector<16x1xf32>
    %22 = arith.divf %20, %21 : vector<16x1xf32>
    %23 = arith.mulf %17, %17 : vector<16x1xf32>
    %24 = arith.subf %22, %23 : vector<16x1xf32>
    %cst_15 = arith.constant 0.000000e+00 : f32
    %25 = vector.broadcast %cst_15 : f32 to vector<16x1xf32>
    %26 = arith.maximumf %24, %25 : vector<16x1xf32>
    %cst_16 = arith.constant 9.99999974E-6 : f32
    %27 = vector.broadcast %cst_16 : f32 to vector<16x1xf32>
    %28 = arith.addf %26, %27 : vector<16x1xf32>
    %29 = math.rsqrt %28 : vector<16x1xf32>
    %30 = vector.broadcast %17 : vector<16x1xf32> to vector<16x32xf32>
    %31 = arith.subf %13, %30 : vector<16x32xf32>
    %32 = vector.broadcast %29 : vector<16x1xf32> to vector<16x32xf32>
    %33 = arith.mulf %31, %32 : vector<16x32xf32>
    %c0_17 = arith.constant 0 : index
    %c0_18 = arith.constant 0 : index
    %34 = vector.load %arg6[%c0_17, %c0_18] : memref<1x32xf32, #tpu.memory_space<vmem>>, vector<1x32xf32>
    %35 = vector.broadcast %34 : vector<1x32xf32> to vector<16x32xf32>
    %36 = arith.mulf %33, %35 : vector<16x32xf32>
    %c0_19 = arith.constant 0 : index
    %c0_20 = arith.constant 0 : index
    %37 = vector.load %arg7[%c0_19, %c0_20] : memref<1x32xf32, #tpu.memory_space<vmem>>, vector<1x32xf32>
    %38 = vector.broadcast %37 : vector<1x32xf32> to vector<16x32xf32>
    %39 = arith.addf %36, %38 : vector<16x32xf32>
    %c0_21 = arith.constant 0 : index
    %c0_22 = arith.constant 0 : index
    %40 = vector.load %arg8[%c0_21, %c0_22] : memref<16x32xf32, #tpu.memory_space<vmem>>, vector<16x32xf32>
    tpu.vector_store %arg8[%c0_21, %c0_22], %39 {strides = array<i32>} : memref<16x32xf32, #tpu.memory_space<vmem>>, vector<16x32xf32>,
    return
  }
  func.func @transform_0(%arg0: i32) -> (i32, i32) {
    %c0_i32 = arith.constant 0 : i32
    %c0_i32_0 = arith.constant 0 : i32
    return %arg0, %c0_i32 : i32, i32
  }
  func.func @transform_1(%arg0: i32) -> (i32, i32) {
    %c0_i32 = arith.constant 0 : i32
    %c0_i32_0 = arith.constant 0 : i32
    %c0_i32_1 = arith.constant 0 : i32
    return %c0_i32, %c0_i32_0 : i32, i32
  }
  func.func @transform_2(%arg0: i32) -> (i32, i32) {
    %c0_i32 = arith.constant 0 : i32
    %c0_i32_0 = arith.constant 0 : i32
    %c0_i32_1 = arith.constant 0 : i32
    return %c0_i32, %c0_i32_0 : i32, i32
  }
  func.func @transform_3(%arg0: i32) -> (i32, i32) {
    %c0_i32 = arith.constant 0 : i32
    %c0_i32_0 = arith.constant 0 : i32
    %c0_i32_1 = arith.constant 0 : i32
    return %c0_i32, %c0_i32_0 : i32, i32
  }
  func.func @transform_4(%arg0: i32) -> (i32, i32) {
    %c0_i32 = arith.constant 0 : i32
    %c0_i32_0 = arith.constant 0 : i32
    %c0_i32_1 = arith.constant 0 : i32
    return %c0_i32, %c0_i32_0 : i32, i32
  }
  func.func @transform_5(%arg0: i32) -> (i32, i32) {
    %c0_i32 = arith.constant 0 : i32
    %c0_i32_0 = arith.constant 0 : i32
    %c0_i32_1 = arith.constant 0 : i32
    return %c0_i32, %c0_i32_0 : i32, i32
  }
  func.func @transform_6(%arg0: i32) -> (i32, i32) {
    %c0_i32 = arith.constant 0 : i32
    %c0_i32_0 = arith.constant 0 : i32
    %c0_i32_1 = arith.constant 0 : i32
    return %c0_i32, %c0_i32_0 : i32, i32
  }
  func.func @transform_7(%arg0: i32) -> (i32, i32) {
    %c0_i32 = arith.constant 0 : i32
    %c0_i32_0 = arith.constant 0 : i32
    return %arg0, %c0_i32 : i32, i32
  }
}

module attributes {stable_mosaic.version = 11 : i64} {
  func.func @ffn_layer_kernel(%arg0: i32, %arg1: memref<16x32xf32, #tpu.memory_space<vmem>>, %arg2: memref<32x128xf32, #tpu.memory_space<vmem>>, %arg3: memref<1x128xf32, #tpu.memory_space<vmem>>, %arg4: memref<128x32xf32, #tpu.memory_space<vmem>>, %arg5: memref<1x32xf32, #tpu.memory_space<vmem>>, %arg6: memref<1x32xf32, #tpu.memory_space<vmem>>, %arg7: memref<1x32xf32, #tpu.memory_space<vmem>>, %arg8: memref<16x32xf32, #tpu.memory_space<vmem>>) attributes {dimension_semantics = [#tpu.dimension_semantics<parallel>], iteration_bounds = array<i64: 1>, scalar_prefetch = 0 : i64, scratch_operands = 0 : i64, tpu.core_type = #tpu.core_type<tc>, window_params = [{transform_indices = @transform_0, window_bounds = array<i64: 16, 32>}, {pipeline_mode = #tpu.pipeline_mode<synchronous>, transform_indices = @transform_1, window_bounds = array<i64: 32, 128>}, {pipeline_mode = #tpu.pipeline_mode<synchronous>, transform_indices = @transform_2, window_bounds = array<i64: 1, 128>}, {pipeline_mode = #tpu.pipeline_mode<synchronous>, transform_indices = @transform_3, window_bounds = array<i64: 128, 32>}, {pipeline_mode = #tpu.pipeline_mode<synchronous>, transform_indices = @transform_4, window_bounds = array<i64: 1, 32>}, {pipeline_mode = #tpu.pipeline_mode<synchronous>, transform_indices = @transform_5, window_bounds = array<i64: 1, 32>}, {pipeline_mode = #tpu.pipeline_mode<synchronous>, transform_indices = @transform_6, window_bounds = array<i64: 1, 32>}, {transform_indices = @transform_7, window_bounds = array<i64: 16, 32>}]} {
    %c0 = arith.constant 0 : index
    %c0_0 = arith.constant 0 : index
    %0 = vector.load %arg1[%c0, %c0_0] : memref<16x32xf32, #tpu.memory_space<vmem>>, vector<16x32xf32>
    %c0_1 = arith.constant 0 : index
    %c0_2 = arith.constant 0 : index
    %1 = vector.load %arg2[%c0_1, %c0_2] : memref<32x128xf32, #tpu.memory_space<vmem>>, vector<32x128xf32>
    %c0_3 = arith.constant 0 : index
    %c0_4 = arith.constant 0 : index
    %2 = vector.load %arg4[%c0_3, %c0_4] : memref<128x32xf32, #tpu.memory_space<vmem>>, vector<128x32xf32>
    %cst = arith.constant dense<0.000000e+00> : vector<16x128xf32>
    %3 = tpu.matmul %0, %1, %cst {dimension_numbers = #tpu.dot_dimension_numbers<[1], [0], [0], [1], [0, 0, 1, 1], [], []>} : vector<16x32xf32>, vector<32x128xf32>, vector<16x128xf32> -> vector<16x128xf32>
    %c0_5 = arith.constant 0 : index
    %c0_6 = arith.constant 0 : index
    %4 = vector.load %arg3[%c0_5, %c0_6] : memref<1x128xf32, #tpu.memory_space<vmem>>, vector<1x128xf32>
    %5 = vector.broadcast %4 : vector<1x128xf32> to vector<16x128xf32>
    %6 = arith.addf %3, %5 : vector<16x128xf32>
    %cst_7 = arith.constant 0.000000e+00 : f32
    %7 = vector.broadcast %cst_7 : f32 to vector<16x128xf32>
    %8 = arith.maximumf %6, %7 : vector<16x128xf32>
    %cst_8 = arith.constant dense<0.000000e+00> : vector<16x32xf32>
    %9 = tpu.matmul %8, %2, %cst_8 {dimension_numbers = #tpu.dot_dimension_numbers<[1], [0], [0], [1], [0, 0, 1, 1], [], []>} : vector<16x128xf32>, vector<128x32xf32>, vector<16x32xf32> -> vector<16x32xf32>
    %c0_9 = arith.constant 0 : index
    %c0_10 = arith.constant 0 : index
    %10 = vector.load %arg5[%c0_9, %c0_10] : memref<1x32xf32, #tpu.memory_space<vmem>>, vector<1x32xf32>
    %11 = vector.broadcast %10 : vector<1x32xf32> to vector<16x32xf32>
    %12 = arith.addf %9, %11 : vector<16x32xf32>
    %13 = arith.addf %0, %12 : vector<16x32xf32>
    %cst_11 = arith.constant dense<0.000000e+00> : vector<16xf32>
    %14 = vector.multi_reduction <add>, %13, %cst_11 [1] : vector<16x32xf32> to vector<16xf32>
    %15 = vector.shape_cast %14 : vector<16xf32> to vector<16x1xf32>
    %cst_12 = arith.constant 3.200000e+01 : f32
    %16 = vector.broadcast %cst_12 : f32 to vector<16x1xf32>
    %17 = arith.divf %15, %16 : vector<16x1xf32>
    %18 = arith.mulf %13, %13 : vector<16x32xf32>
    %cst_13 = arith.constant dense<0.000000e+00> : vector<16xf32>
    %19 = vector.multi_reduction <add>, %18, %cst_13 [1] : vector<16x32xf32> to vector<16xf32>
    %20 = vector.shape_cast %19 : vector<16xf32> to vector<16x1xf32>
    %cst_14 = arith.constant 3.200000e+01 : f32
    %21 = vector.broadcast %cst_14 : f32 to vector<16x1xf32>
    %22 = arith.divf %20, %21 : vector<16x1xf32>
    %23 = arith.mulf %17, %17 : vector<16x1xf32>
    %24 = arith.subf %22, %23 : vector<16x1xf32>
    %cst_15 = arith.constant 0.000000e+00 : f32
    %25 = vector.broadcast %cst_15 : f32 to vector<16x1xf32>
    %26 = arith.maximumf %24, %25 : vector<16x1xf32>
    %cst_16 = arith.constant 9.99999974E-6 : f32
    %27 = vector.broadcast %cst_16 : f32 to vector<16x1xf32>
    %28 = arith.addf %26, %27 : vector<16x1xf32>
    %29 = math.rsqrt %28 : vector<16x1xf32>
    %30 = vector.broadcast %17 : vector<16x1xf32> to vector<16x32xf32>
    %31 = arith.subf %13, %30 : vector<16x32xf32>
    %32 = vector.broadcast %29 : vector<16x1xf32> to vector<16x32xf32>
    %33 = arith.mulf %31, %32 : vector<16x32xf32>
    %c0_17 = arith.constant 0 : index
    %c0_18 = arith.constant 0 : index
    %34 = vector.load %arg6[%c0_17, %c0_18] : memref<1x32xf32, #tpu.memory_space<vmem>>, vector<1x32xf32>
    %35 = vector.broadcast %34 : vector<1x32xf32> to vector<16x32xf32>
    %36 = arith.mulf %33, %35 : vector<16x32xf32>
    %c0_19 = arith.constant 0 : index
    %c0_20 = arith.constant 0 : index
    %37 = vector.load %arg7[%c0_19, %c0_20] : memref<1x32xf32, #tpu.memory_space<vmem>>, vector<1x32xf32>
    %38 = vector.broadcast %37 : vector<1x32xf32> to vector<16x32xf32>
    %39 = arith.addf %36, %38 : vector<16x32xf32>
    %c0_21 = arith.constant 0 : index
    %c0_22 = arith.constant 0 : index
    %40 = vector.load %arg8[%c0_21, %c0_22] : memref<16x32xf32, #tpu.memory_space<vmem>>, vector<16x32xf32>
    tpu.vector_store %arg8[%c0_21, %c0_22], %39 {strides = array<i32>} : memref<16x32xf32, #tpu.memory_space<vmem>>, vector<16x32xf32>,
    return
  }
  func.func @transform_0(%arg0: i32) -> (i32, i32) {
    %c0_i32 = arith.constant 0 : i32
    %c0_i32_0 = arith.constant 0 : i32
    return %arg0, %c0_i32 : i32, i32
  }
  func.func @transform_1(%arg0: i32) -> (i32, i32) {
    %c0_i32 = arith.constant 0 : i32
    %c0_i32_0 = arith.constant 0 : i32
    %c0_i32_1 = arith.constant 0 : i32
    return %c0_i32, %c0_i32_0 : i32, i32
  }
  func.func @transform_2(%arg0: i32) -> (i32, i32) {
    %c0_i32 = arith.constant 0 : i32
    %c0_i32_0 = arith.constant 0 : i32
    %c0_i32_1 = arith.constant 0 : i32
    return %c0_i32, %c0_i32_0 : i32, i32
  }
  func.func @transform_3(%arg0: i32) -> (i32, i32) {
    %c0_i32 = arith.constant 0 : i32
    %c0_i32_0 = arith.constant 0 : i32
    %c0_i32_1 = arith.constant 0 : i32
    return %c0_i32, %c0_i32_0 : i32, i32
  }
  func.func @transform_4(%arg0: i32) -> (i32, i32) {
    %c0_i32 = arith.constant 0 : i32
    %c0_i32_0 = arith.constant 0 : i32
    %c0_i32_1 = arith.constant 0 : i32
    return %c0_i32, %c0_i32_0 : i32, i32
  }
  func.func @transform_5(%arg0: i32) -> (i32, i32) {
    %c0_i32 = arith.constant 0 : i32
    %c0_i32_0 = arith.constant 0 : i32
    %c0_i32_1 = arith.constant 0 : i32
    return %c0_i32, %c0_i32_0 : i32, i32
  }
  func.func @transform_6(%arg0: i32) -> (i32, i32) {
    %c0_i32 = arith.constant 0 : i32
    %c0_i32_0 = arith.constant 0 : i32
    %c0_i32_1 = arith.constant 0 : i32
    return %c0_i32, %c0_i32_0 : i32, i32
  }
  func.func @transform_7(%arg0: i32) -> (i32, i32) {
    %c0_i32 = arith.constant 0 : i32
    %c0_i32_0 = arith.constant 0 : i32
    return %arg0, %c0_i32 : i32, i32
  }
}

</mosaic_0001>

<bundles_post_ra>
// kernel: _ffn_layer_2d.1
= control target key start
LH: loop header
LB: loop body
LE: loop exit
PB: predicated region body
PF: predicated region fallthrough
CT: control target
= control target key end

     0   :  { %vm56_vm0 = vcmask 261120   ;;  %s585_s0 = inlined_call_operand.vmem [shape: f32[16,32], index: 0, kind: input, shape index: {}]   ;;  %s586_s1 = inlined_call_operand.vmem [shape: f32[32,128], index: 1, kind: input, shape index: {}]   ;;  %s587_s2 = inlined_call_operand.vmem [shape: f32[1,128], index: 2, kind: input, shape index: {}]   ;;  %s588_s3 = inlined_call_operand.vmem [shape: f32[128,32], index: 3, kind: input, shape index: {}]   ;;  %s589_s4 = inlined_call_operand.vmem [shape: f32[1,32], index: 4, kind: input, shape index: {}]   ;;  %s590_s5 = inlined_call_operand.vmem [shape: f32[1,32], index: 5, kind: input, shape index: {}]   ;;  %s591_s6 = inlined_call_operand.vmem [shape: f32[1,32], index: 6, kind: input, shape index: {}]   ;;  %s592_s7 = inlined_call_operand.hbm [shape: f32[16,32], index: 7, kind: output, shape index: {}]  }
   0x1   :  { %v29_v0 = vld [vmem:[%s586_s1] sm:$0xff]  ;;  %v30_v1 = vld [vmem:[%s586_s1 + $0x8] sm:$0xff]  ;;  %v31_v2 = vld [vmem:[%s586_s1 + $0x10] sm:$0xff] }
   0x2   :  { %v369_v3 = vpack.c.bf16 %v30_v1, %v29_v0  ;;  %v32_v4 = vld [vmem:[%s586_s1 + $0x18] sm:$0xff]  ;;  %v498_v5 = vld [vmem:[%s585_s0] sm:$0xff]  ;;  %v34_v8 = vld [vmem:[%s588_s3 + $0x8] sm:$0xff] }
   0x3   :  { %v373_v6 = vpack.c.bf16 %v32_v4, %v31_v2  ;;  %331 = vmatprep.mubr.msk.f32.mxu0 %vm56_vm0, %v498_v5  ;;  %v33_v7 = vld [vmem:[%s588_s3] sm:$0xff]  ;;  %v35_v9 = vld [vmem:[%s588_s3 + $0x10] sm:$0xff]  ;;  %v36_v11 = vld [vmem:[%s588_s3 + $0x18] sm:$0xff] }
   0x4   :  { %370 = vmatprep.subr.bf16.mxu0 %v369_v3  ;;  %v377_v10 = vpack.c.bf16 %v34_v8, %v33_v7  ;;  %v381_v12 = vpack.c.bf16 %v36_v11, %v35_v9  ;;  %v37_v13 = vld [vmem:[%s588_s3 + $0x20] sm:$0xff]  ;;  %v38_v14 = vld [vmem:[%s588_s3 + $0x28] sm:$0xff] }
   0x5   :  { %372 = vmatpush3.bf16.msra.mxu0 %v369_v3 }
   0x6   :  { %374 = vmatprep.subr.bf16.mxu0 %v373_v6  ;;  %378 = vmatprep.subr.bf16.mxu1 %v377_v10 }
   0x7   :  { %380 = vmatpush3.bf16.msra.mxu1 %v377_v10 }
   0x8   :  { %12 = vsyncpa [#allocation3], 0  ;;  %382 = vmatprep.subr.bf16.mxu1 %v381_v12  ;;  %v385_v15 = vpack.c.bf16 %v38_v14, %v37_v13  ;;  %v28_v16 = vld [vmem:[%s585_s0 + $0x8] sm:$0xff]  ;;  %v39_v17 = vld [vmem:[%s588_s3 + $0x30] sm:$0xff]  ;;  %s440_s24 = smov [#allocation2]  }
   0x9   :  { %376 = vmatpush3.bf16.msra.mxu0 %v373_v6  ;;  %v40_v18 = vld [vmem:[%s588_s3 + $0x38] sm:$0xff]  ;;  %v41_v20 = vld [vmem:[%s588_s3 + $0x40] sm:$0xff]  ;;  %v42_v21 = vld [vmem:[%s588_s3 + $0x48] sm:$0xff]  ;;  %s282_s25 = sshll.u32 %s440_s24, 4  ;;  %s283_s25 = int_to_ptr.vmem [resolvable:$true] %s282_s25 }
   0xa   :  { %v389_v19 = vpack.c.bf16 %v40_v18, %v39_v17  ;;  %v393_v22 = vpack.c.bf16 %v42_v21, %v41_v20  ;;  %v43_v23 = vld [vmem:[%s588_s3 + $0x50] sm:$0xff]  ;;  %v44_v24 = vld [vmem:[%s588_s3 + $0x58] sm:$0xff]  ;;  %v45_v26 = vld [vmem:[%s588_s3 + $0x60] sm:$0xff]  ;;  %p421_p1 = scmp.lt.s32.totalorder %s283_s25, %s283_s25 }
   0xb   :  { %384 = vmatpush3.bf16.msra.mxu1 %v381_v12  ;;  %v397_v25 = vpack.c.bf16 %v44_v24, %v43_v23  ;;  %v46_v27 = vld [vmem:[%s588_s3 + $0x68] sm:$0xff]  ;;  %v47_v29 = vld [vmem:[%s588_s3 + $0x70] sm:$0xff]  ;;  %v48_v30 = vld [vmem:[%s588_s3 + $0x78] sm:$0xff] }
   0xc   :  { %332 = vmatmul.mubr.msk.f32.vlgmr.msra.gmra.mrb[0].mxu0 %vm56_vm0, %v28_v16  ;;  %386 = vmatprep.subr.bf16.mxu1 %v385_v15  ;;  %v401_v28 = vpack.c.bf16 %v46_v27, %v45_v26  ;;  %v405_v31 = vpack.c.bf16 %v48_v30, %v47_v29  ;;  %v293_v32 = vld [vmem:[%s587_s2] ss:$0 sm:$0xff] }
   0xd   :  { %v296_v39 = vld [vmem:[%s589_s4] ss:$0 sm:$0xff] }
   0xe   :  { %v297_v6 = vld [vmem:[%s590_s5] ss:$0 sm:$0xff]  ;;  %s416_s5 = scalar_lea.vmem %s283_s25, 256 }
   0xf   :  { %388 = vmatpush3.bf16.msra.mxu1 %v385_v15  ;;  %v298_v8 = vld [vmem:[%s591_s6] ss:$0 sm:$0xff]  ;;  %p417_p0 = scmp.ne.s32.totalorder %s283_s25, %s416_s5  ;;  %p422_p2 = scmp.lt.s32.totalorder %s416_s5, %s416_s5 }
  0x10   :  { %390 = vmatprep.subr.bf16.mxu1 %v389_v19 }
  0x11   :  { %p423_p3 = por %p422_p2, %p421_p1 }
  0x13   :  { %392 = vmatpush3.bf16.msra.mxu1 %v389_v19  ;;  %p424_p4 = pnand %p423_p3, %p417_p0 }
  0x14   :  { %394 = vmatprep.subr.bf16.mxu1 %v393_v22 }
  0x17   :  { %396 = vmatpush3.bf16.msra.mxu1 %v393_v22 }
  0x18   :  { %398 = vmatprep.subr.bf16.mxu1 %v397_v25 }
  0x1b   :  { %400 = vmatpush3.bf16.msra.mxu1 %v397_v25 }
  0x1c   :  { %402 = vmatprep.subr.bf16.mxu1 %v401_v28 }
  0x1f   :  { %404 = vmatpush3.bf16.msra.mxu1 %v401_v28 }
  0x20   :  { %406 = vmatprep.subr.bf16.mxu1 %v405_v31 }
  0x23   :  { %408 = vmatpush3.bf16.msra.mxu1 %v405_v31 }
  0xdf   :  { %v333_v33 = vpop.f32.mrb[0].mxu0 }
  0xe0   :  { %v135_v34 = vadd.f32 %v333_v33, %v293_v32  ;;  %v129_v35 = vpop.f32.mrb[1].mxu0 }
  0xe1   :  { %v130_v36 = vadd.f32 %v293_v32, %v129_v35 }
  0xe2   :  { %v139_v38 = vmax.f32 %v135_v34, 0.0 }
  0xe3   :  { %v138_v37 = vmax.f32 %v130_v36, 0.0 }
  0xe5   :  { %366 = vmatprep.mubr.f32.mxu1 %v138_v37 }
  0xe6   :  { %367 = vmatmul.mubr.f32.vlgmr.msra.gmra.mrb[0].mxu1 %v139_v38 }
 0x1b9   :  { %v368_v40 = vpop.f32.mrb[0].mxu1 }
 0x1ba   :  { %v219_v41 = vadd.f32 %v368_v40, %v296_v39  ;;  %v213_v42 = vpop.f32.mrb[1].mxu1 }
 0x1bb   :  { %v214_v43 = vadd.f32 %v296_v39, %v213_v42 }
 0x1bc   :  { %v223_v44 = vadd.f32 %v219_v41, %v28_v16 }
 0x1bd   :  { %v222_v45 = vadd.f32 %v214_v43, %v498_v5 }
 0x1be   :  { %v234_v49 = vmul.f32 %v223_v44, %v223_v44  ;;  %v227_v50 = vsel %vm56_vm0, %v223_v44, 0.0 }
 0x1bf   :  { %v224_v46 = vsel %vm56_vm0, %v222_v45, 0.0  ;;  %v233_v47 = vmul.f32 %v222_v45, %v222_v45 }
 0x1c0   :  { %225 = vadd.xlane.f32.xlu0 %v224_v46  ;;  %v238_v51 = vsel %vm56_vm0, %v234_v49, 0.0 }
 0x1c1   :  { %v235_v48 = vsel %vm56_vm0, %v233_v47, 0.0 }
 0x1c2   :  { %236 = vadd.xlane.f32.xlu1 %v235_v48 }
 0x1c4   :  { %228 = vadd.xlane.f32.xlu0 %v227_v50 }
 0x1c6   :  { %239 = vadd.xlane.f32.xlu1 %v238_v51 }
 0x24d   :  { %v226_v52 = vpop.xlane.xlu0 %225 }
 0x24e   :  { %v231_v53 = vmul.f32 0.03125, %v226_v52 }
 0x24f   :  { %v237_v54 = vpop.xlane.xlu1 %236 }
 0x250   :  { %v243_v55 = vmul.f32 %v231_v53, %v231_v53  ;;  %v241_v56 = vmul.f32 0.03125, %v237_v54  ;;  %v253_v4 = vsub.f32 %v222_v45, %v231_v53 }
 0x251   :  { %v229_v57 = vpop.xlane.xlu0 %228 }
 0x252   :  { %v245_v58 = vsub.f32 %v241_v56, %v243_v55  ;;  %v232_v59 = vmul.f32 0.03125, %v229_v57 }
 0x253   :  { %v240_v60 = vpop.xlane.xlu1 %239 }
 0x254   :  { %v247_v61 = vmax.f32 %v245_v58, 0.0  ;;  %v244_v62 = vmul.f32 %v232_v59, %v232_v59  ;;  %v242_v63 = vmul.f32 0.03125, %v240_v60  ;;  %v254_v9 = vsub.f32 %v223_v44, %v232_v59 }
 0x256   :  { %v249_v0 = vadd.f32 1e-05, %v247_v61  ;;  %v246_v1 = vsub.f32 %v242_v63, %v244_v62 }
 0x258   :  { %412 = vrsqrt.f32 %v249_v0  ;;  %v248_v2 = vmax.f32 %v246_v1, 0.0 }
 0x25a   :  { %v250_v3 = vadd.f32 1e-05, %v248_v2 }
 0x25c   :  { %414 = vrsqrt.f32 %v250_v3 }
 0x262   :  { %v413_v5 = vpop.eup %412 }
 0x263   :  { %v255_v7 = vmul.f32 %v413_v5, %v253_v4 }
 0x265   :  { %v264_v10 = vmul.f32 %v297_v6, %v255_v7 }
 0x266   :  { %v415_v11 = vpop.eup %414 }
 0x267   :  { %v256_v12 = vmul.f32 %v415_v11, %v254_v9  ;;  %v273_v13 = vadd.f32 %v298_v8, %v264_v10 }
 0x269   :  { %v265_v14 = vmul.f32 %v297_v6, %v256_v12  ;;  %275 = vst.msk [vmem:[#allocation2] sm:$0xff] %vm56_vm0, %v273_v13 }
 0x26b   :  { %v274_v15 = vadd.f32 %v298_v8, %v265_v14 }
 0x26d   :  { %276 = vst.msk [vmem:[#allocation2 + $0x8] sm:$0xff] %vm56_vm0, %v274_v15 }
 0x26e   :  { %427 = shalt.err (!%p424_p4)
}
 0x26f   :  { %s428_s27 = scalar_lea.hbm %s592_s7, 256 }
 0x270   :  { %p429_p5 = scmp.ne.s32.totalorder %s592_s7, %s428_s27  ;;  %p432_p6 = scmp.lt.u32.totalorder %s428_s27, %s592_s7 }
 0x272   :  { %p434_p7 = pnand %p432_p6, %p429_p5 }
 0x274   :  { %437 = shalt.err (!%p434_p7)
}
 0x275   :  { %s441_s0 = smov 128   ;;  %s442_s9 = smov 8  }
 0x276   :  { %288 = dma.vmem_to_hbm [thread:$0]  %s283_s25, 256, %s592_s7, [#allocation3], %s441_s0, %s441_s0, %s442_s9  }
 0x277   :  { %438 = dma.done.wait [#allocation3], 256  }
 0x278   :  { %439 = vsyncadd [#allocation3], 4294967040 }
 0x279   :  { %292 = vsyncpa [#allocation3], 1 }

// kernel: _ffn_layer_2d.1
= control target key start
LH: loop header
LB: loop body
LE: loop exit
PB: predicated region body
PF: predicated region fallthrough
CT: control target
= control target key end

     0   :  { %vm56_vm0 = vcmask 261120   ;;  %s585_s0 = inlined_call_operand.vmem [shape: f32[16,32], index: 0, kind: input, shape index: {}]   ;;  %s586_s1 = inlined_call_operand.vmem [shape: f32[32,128], index: 1, kind: input, shape index: {}]   ;;  %s587_s2 = inlined_call_operand.vmem [shape: f32[1,128], index: 2, kind: input, shape index: {}]   ;;  %s588_s3 = inlined_call_operand.vmem [shape: f32[128,32], index: 3, kind: input, shape index: {}]   ;;  %s589_s4 = inlined_call_operand.vmem [shape: f32[1,32], index: 4, kind: input, shape index: {}]   ;;  %s590_s5 = inlined_call_operand.vmem [shape: f32[1,32], index: 5, kind: input, shape index: {}]   ;;  %s591_s6 = inlined_call_operand.vmem [shape: f32[1,32], index: 6, kind: input, shape index: {}]   ;;  %s592_s7 = inlined_call_operand.hbm [shape: f32[16,32], index: 7, kind: output, shape index: {}]  }
   0x1   :  { %v29_v0 = vld [vmem:[%s586_s1] sm:$0xff]  ;;  %v30_v1 = vld [vmem:[%s586_s1 + $0x8] sm:$0xff]  ;;  %v31_v2 = vld [vmem:[%s586_s1 + $0x10] sm:$0xff] }
   0x2   :  { %v369_v3 = vpack.c.bf16 %v30_v1, %v29_v0  ;;  %v32_v4 = vld [vmem:[%s586_s1 + $0x18] sm:$0xff]  ;;  %v498_v5 = vld [vmem:[%s585_s0] sm:$0xff]  ;;  %v34_v8 = vld [vmem:[%s588_s3 + $0x8] sm:$0xff] }
   0x3   :  { %v373_v6 = vpack.c.bf16 %v32_v4, %v31_v2  ;;  %331 = vmatprep.mubr.msk.f32.mxu0 %vm56_vm0, %v498_v5  ;;  %v33_v7 = vld [vmem:[%s588_s3] sm:$0xff]  ;;  %v35_v9 = vld [vmem:[%s588_s3 + $0x10] sm:$0xff]  ;;  %v36_v11 = vld [vmem:[%s588_s3 + $0x18] sm:$0xff] }
   0x4   :  { %370 = vmatprep.subr.bf16.mxu0 %v369_v3  ;;  %v377_v10 = vpack.c.bf16 %v34_v8, %v33_v7  ;;  %v381_v12 = vpack.c.bf16 %v36_v11, %v35_v9  ;;  %v37_v13 = vld [vmem:[%s588_s3 + $0x20] sm:$0xff]  ;;  %v38_v14 = vld [vmem:[%s588_s3 + $0x28] sm:$0xff] }
   0x5   :  { %372 = vmatpush3.bf16.msra.mxu0 %v369_v3 }
   0x6   :  { %374 = vmatprep.subr.bf16.mxu0 %v373_v6  ;;  %378 = vmatprep.subr.bf16.mxu1 %v377_v10 }
   0x7   :  { %380 = vmatpush3.bf16.msra.mxu1 %v377_v10 }
   0x8   :  { %12 = vsyncpa [#allocation3], 0  ;;  %382 = vmatprep.subr.bf16.mxu1 %v381_v12  ;;  %v385_v15 = vpack.c.bf16 %v38_v14, %v37_v13  ;;  %v28_v16 = vld [vmem:[%s585_s0 + $0x8] sm:$0xff]  ;;  %v39_v17 = vld [vmem:[%s588_s3 + $0x30] sm:$0xff]  ;;  %s440_s24 = smov [#allocation2]  }
   0x9   :  { %376 = vmatpush3.bf16.msra.mxu0 %v373_v6  ;;  %v40_v18 = vld [vmem:[%s588_s3 + $0x38] sm:$0xff]  ;;  %v41_v20 = vld [vmem:[%s588_s3 + $0x40] sm:$0xff]  ;;  %v42_v21 = vld [vmem:[%s588_s3 + $0x48] sm:$0xff]  ;;  %s282_s25 = sshll.u32 %s440_s24, 4  ;;  %s283_s25 = int_to_ptr.vmem [resolvable:$true] %s282_s25 }
   0xa   :  { %v389_v19 = vpack.c.bf16 %v40_v18, %v39_v17  ;;  %v393_v22 = vpack.c.bf16 %v42_v21, %v41_v20  ;;  %v43_v23 = vld [vmem:[%s588_s3 + $0x50] sm:$0xff]  ;;  %v44_v24 = vld [vmem:[%s588_s3 + $0x58] sm:$0xff]  ;;  %v45_v26 = vld [vmem:[%s588_s3 + $0x60] sm:$0xff]  ;;  %p421_p1 = scmp.lt.s32.totalorder %s283_s25, %s283_s25 }
   0xb   :  { %384 = vmatpush3.bf16.msra.mxu1 %v381_v12  ;;  %v397_v25 = vpack.c.bf16 %v44_v24, %v43_v23  ;;  %v46_v27 = vld [vmem:[%s588_s3 + $0x68] sm:$0xff]  ;;  %v47_v29 = vld [vmem:[%s588_s3 + $0x70] sm:$0xff]  ;;  %v48_v30 = vld [vmem:[%s588_s3 + $0x78] sm:$0xff] }
   0xc   :  { %332 = vmatmul.mubr.msk.f32.vlgmr.msra.gmra.mrb[0].mxu0 %vm56_vm0, %v28_v16  ;;  %386 = vmatprep.subr.bf16.mxu1 %v385_v15  ;;  %v401_v28 = vpack.c.bf16 %v46_v27, %v45_v26  ;;  %v405_v31 = vpack.c.bf16 %v48_v30, %v47_v29  ;;  %v293_v32 = vld [vmem:[%s587_s2] ss:$0 sm:$0xff] }
   0xd   :  { %v296_v39 = vld [vmem:[%s589_s4] ss:$0 sm:$0xff] }
   0xe   :  { %v297_v6 = vld [vmem:[%s590_s5] ss:$0 sm:$0xff]  ;;  %s416_s5 = scalar_lea.vmem %s283_s25, 256 }
   0xf   :  { %388 = vmatpush3.bf16.msra.mxu1 %v385_v15  ;;  %v298_v8 = vld [vmem:[%s591_s6] ss:$0 sm:$0xff]  ;;  %p417_p0 = scmp.ne.s32.totalorder %s283_s25, %s416_s5  ;;  %p422_p2 = scmp.lt.s32.totalorder %s416_s5, %s416_s5 }
  0x10   :  { %390 = vmatprep.subr.bf16.mxu1 %v389_v19 }
  0x11   :  { %p423_p3 = por %p422_p2, %p421_p1 }
  0x13   :  { %392 = vmatpush3.bf16.msra.mxu1 %v389_v19  ;;  %p424_p4 = pnand %p423_p3, %p417_p0 }
  0x14   :  { %394 = vmatprep.subr.bf16.mxu1 %v393_v22 }
  0x17   :  { %396 = vmatpush3.bf16.msra.mxu1 %v393_v22 }
  0x18   :  { %398 = vmatprep.subr.bf16.mxu1 %v397_v25 }
  0x1b   :  { %400 = vmatpush3.bf16.msra.mxu1 %v397_v25 }
  0x1c   :  { %402 = vmatprep.subr.bf16.mxu1 %v401_v28 }
  0x1f   :  { %404 = vmatpush3.bf16.msra.mxu1 %v401_v28 }
  0x20   :  { %406 = vmatprep.subr.bf16.mxu1 %v405_v31 }
  0x23   :  { %408 = vmatpush3.bf16.msra.mxu1 %v405_v31 }
  0xdf   :  { %v333_v33 = vpop.f32.mrb[0].mxu0 }
  0xe0   :  { %v135_v34 = vadd.f32 %v333_v33, %v293_v32  ;;  %v129_v35 = vpop.f32.mrb[1].mxu0 }
  0xe1   :  { %v130_v36 = vadd.f32 %v293_v32, %v129_v35 }
  0xe2   :  { %v139_v38 = vmax.f32 %v135_v34, 0.0 }
  0xe3   :  { %v138_v37 = vmax.f32 %v130_v36, 0.0 }
  0xe5   :  { %366 = vmatprep.mubr.f32.mxu1 %v138_v37 }
  0xe6   :  { %367 = vmatmul.mubr.f32.vlgmr.msra.gmra.mrb[0].mxu1 %v139_v38 }
 0x1b9   :  { %v368_v40 = vpop.f32.mrb[0].mxu1 }
 0x1ba   :  { %v219_v41 = vadd.f32 %v368_v40, %v296_v39  ;;  %v213_v42 = vpop.f32.mrb[1].mxu1 }
 0x1bb   :  { %v214_v43 = vadd.f32 %v296_v39, %v213_v42 }
 0x1bc   :  { %v223_v44 = vadd.f32 %v219_v41, %v28_v16 }
 0x1bd   :  { %v222_v45 = vadd.f32 %v214_v43, %v498_v5 }
 0x1be   :  { %v234_v49 = vmul.f32 %v223_v44, %v223_v44  ;;  %v227_v50 = vsel %vm56_vm0, %v223_v44, 0.0 }
 0x1bf   :  { %v224_v46 = vsel %vm56_vm0, %v222_v45, 0.0  ;;  %v233_v47 = vmul.f32 %v222_v45, %v222_v45 }
 0x1c0   :  { %225 = vadd.xlane.f32.xlu0 %v224_v46  ;;  %v238_v51 = vsel %vm56_vm0, %v234_v49, 0.0 }
 0x1c1   :  { %v235_v48 = vsel %vm56_vm0, %v233_v47, 0.0 }
 0x1c2   :  { %236 = vadd.xlane.f32.xlu1 %v235_v48 }
 0x1c4   :  { %228 = vadd.xlane.f32.xlu0 %v227_v50 }
 0x1c6   :  { %239 = vadd.xlane.f32.xlu1 %v238_v51 }
 0x24d   :  { %v226_v52 = vpop.xlane.xlu0 %225 }
 0x24e   :  { %v231_v53 = vmul.f32 0.03125, %v226_v52 }
 0x24f   :  { %v237_v54 = vpop.xlane.xlu1 %236 }
 0x250   :  { %v243_v55 = vmul.f32 %v231_v53, %v231_v53  ;;  %v241_v56 = vmul.f32 0.03125, %v237_v54  ;;  %v253_v4 = vsub.f32 %v222_v45, %v231_v53 }
 0x251   :  { %v229_v57 = vpop.xlane.xlu0 %228 }
 0x252   :  { %v245_v58 = vsub.f32 %v241_v56, %v243_v55  ;;  %v232_v59 = vmul.f32 0.03125, %v229_v57 }
 0x253   :  { %v240_v60 = vpop.xlane.xlu1 %239 }
 0x254   :  { %v247_v61 = vmax.f32 %v245_v58, 0.0  ;;  %v244_v62 = vmul.f32 %v232_v59, %v232_v59  ;;  %v242_v63 = vmul.f32 0.03125, %v240_v60  ;;  %v254_v9 = vsub.f32 %v223_v44, %v232_v59 }
 0x256   :  { %v249_v0 = vadd.f32 1e-05, %v247_v61  ;;  %v246_v1 = vsub.f32 %v242_v63, %v244_v62 }
 0x258   :  { %412 = vrsqrt.f32 %v249_v0  ;;  %v248_v2 = vmax.f32 %v246_v1, 0.0 }
 0x25a   :  { %v250_v3 = vadd.f32 1e-05, %v248_v2 }
 0x25c   :  { %414 = vrsqrt.f32 %v250_v3 }
 0x262   :  { %v413_v5 = vpop.eup %412 }
 0x263   :  { %v255_v7 = vmul.f32 %v413_v5, %v253_v4 }
 0x265   :  { %v264_v10 = vmul.f32 %v297_v6, %v255_v7 }
 0x266   :  { %v415_v11 = vpop.eup %414 }
 0x267   :  { %v256_v12 = vmul.f32 %v415_v11, %v254_v9  ;;  %v273_v13 = vadd.f32 %v298_v8, %v264_v10 }
 0x269   :  { %v265_v14 = vmul.f32 %v297_v6, %v256_v12  ;;  %275 = vst.msk [vmem:[#allocation2] sm:$0xff] %vm56_vm0, %v273_v13 }
 0x26b   :  { %v274_v15 = vadd.f32 %v298_v8, %v265_v14 }
 0x26d   :  { %276 = vst.msk [vmem:[#allocation2 + $0x8] sm:$0xff] %vm56_vm0, %v274_v15 }
 0x26e   :  { %427 = shalt.err (!%p424_p4)
}
 0x26f   :  { %s428_s27 = scalar_lea.hbm %s592_s7, 256 }
 0x270   :  { %p429_p5 = scmp.ne.s32.totalorder %s592_s7, %s428_s27  ;;  %p432_p6 = scmp.lt.u32.totalorder %s428_s27, %s592_s7 }
 0x272   :  { %p434_p7 = pnand %p432_p6, %p429_p5 }
 0x274   :  { %437 = shalt.err (!%p434_p7)
}
 0x275   :  { %s441_s0 = smov 128   ;;  %s442_s9 = smov 8  }
 0x276   :  { %288 = dma.vmem_to_hbm [thread:$0]  %s283_s25, 256, %s592_s7, [#allocation3], %s441_s0, %s441_s0, %s442_s9  }
 0x277   :  { %438 = dma.done.wait [#allocation3], 256  }
 0x278   :  { %439 = vsyncadd [#allocation3], 4294967040 }
 0x279   :  { %292 = vsyncpa [#allocation3], 1 }

</bundles_post_ra>
